<compile_context>
chip_gen: v5e
topology: v5e:2x2
jax: 0.10.0
libtpu: 0.0.40
codegen_flags: <defaults>
</compile_context>

<pallas_src>
import math

import jax
import jax.numpy as jnp
from jax.experimental import pallas as pl
from jax.experimental.pallas import tpu as pltpu


N_INPUTS = 2
N_NODES = 20
N_LAYERS = 3          # number of hidden (ReLU) layers
LANES = 128

# Default tile cap (lanes).  Review suggests sweeping 32768-65536; 32768 keeps
# the in-kernel (20, tile) f32 temporaries comfortably inside even v5e's
# 16 MiB scoped-VMEM default while still amortizing the ~0.35 us per-step
# pipeline overhead over 256 vregs of batch.
MAX_TILE = 32768


def _round_up(x, m):
    return ((x + m - 1) // m) * m


def _cdiv(a, b):
    return (a + b - 1) // b


# ----- packed parameter layout ------------------------------------------------
# f32 "vector" buffer: (VEC_ROWS, 128).  Rows 0..19, one column vector per lane:
#   lane 0: W0^T[:,0]   lane 1: W0^T[:,1]   lane 2: W3[:,0]
#   lane 3: b0          lane 4: b1          lane 5: b2        lane 6: [b3, 0...]
VEC_ROWS = _round_up(N_NODES, 8)          # 24
LANE_W0C0, LANE_W0C1, LANE_W3, LANE_B0, LANE_B1, LANE_B2, LANE_B3 = range(7)

# bf16 matrix buffer: (WMAT_ROWS, 128).  W1^T at rows 0..19, W2^T at rows 32..51
# (row offsets are multiples of the bf16 sublane tile of 16).
ROW_W1T = 0
ROW_W2T = 32
WMAT_ROWS = 64


def mlp_kernel(xT_ref, vec_ref, wmat_ref, o_ref):
    # xT_ref  : (N_INPUTS, tile_b) f32   -- batch on the lane axis
    # vec_ref : (VEC_ROWS, 128)    f32   -- packed column vectors (grid-invariant)
    # wmat_ref: (WMAT_ROWS, 128)   bf16  -- packed W1^T / W2^T (grid-invariant)
    # o_ref   : (1, tile_b)        f32
    xT = xT_ref[...]                                                  # (2, tb)

    w0_c0 = vec_ref[pl.ds(0, N_NODES), pl.ds(LANE_W0C0, 1)]          # (20, 1)
    w0_c1 = vec_ref[pl.ds(0, N_NODES), pl.ds(LANE_W0C1, 1)]          # (20, 1)
    w3c   = vec_ref[pl.ds(0, N_NODES), pl.ds(LANE_W3, 1)]            # (20, 1)
    b0    = vec_ref[pl.ds(0, N_NODES), pl.ds(LANE_B0, 1)]            # (20, 1)
    b1    = vec_ref[pl.ds(0, N_NODES), pl.ds(LANE_B1, 1)]            # (20, 1)
    b2    = vec_ref[pl.ds(0, N_NODES), pl.ds(LANE_B2, 1)]            # (20, 1)
    b3    = vec_ref[pl.ds(0, 1),       pl.ds(LANE_B3, 1)]            # (1, 1)

    w1t = wmat_ref[pl.ds(ROW_W1T, N_NODES), pl.ds(0, N_NODES)]       # (20, 20) bf16
    w2t = wmat_ref[pl.ds(ROW_W2T, N_NODES), pl.ds(0, N_NODES)]       # (20, 20) bf16

    # Layer 0 (K=2): two VPU broadcast FMAs -- keep the tiny contraction off
    # the MXU and out of the serialized matmul chain.
    y = w0_c0 * xT[0:1, :] + w0_c1 * xT[1:2, :] + b0                  # (20, tb) f32
    y = jnp.maximum(y, 0.0)

    # Hidden layers: y^T = W^T @ y^T on the MXU with bf16 operands and f32
    # accumulation; batch stays on the lane axis.
    y = jnp.dot(w1t, y.astype(jnp.bfloat16),
                preferred_element_type=jnp.float32) + b1              # (20, tb) f32
    y = jnp.maximum(y, 0.0)
    y = jnp.dot(w2t, y.astype(jnp.bfloat16),
                preferred_element_type=jnp.float32) + b2              # (20, tb) f32
    y = jnp.maximum(y, 0.0)

    # Output layer (M=1): VPU multiply + XLU sublane reduce instead of an
    # M=1 MXU pass.
    y = jnp.sum(w3c * y, axis=0, keepdims=True) + b3                  # (1, tb)
    o_ref[...] = jax.nn.sigmoid(y)


def pack_params(params):
    """Pack weights/biases into (vec_f32 (24,128), wmat_bf16 (64,128)).

    params: list of (W, b) with W (in_features, out_features), b (out_features,).
    The 20x20 weights are stored transposed (out, in) so the kernel computes
    y^T = W^T @ x^T.
    """
    (w0, b0), (w1, b1), (w2, b2), (w3, b3) = params

    vec = jnp.zeros((VEC_ROWS, LANES), jnp.float32)
    vec = vec.at[0:N_NODES, LANE_W0C0].set(w0[0, :])
    vec = vec.at[0:N_NODES, LANE_W0C1].set(w0[1, :])
    vec = vec.at[0:N_NODES, LANE_W3].set(w3[:, 0])
    vec = vec.at[0:N_NODES, LANE_B0].set(b0)
    vec = vec.at[0:N_NODES, LANE_B1].set(b1)
    vec = vec.at[0:N_NODES, LANE_B2].set(b2)
    vec = vec.at[0, LANE_B3].set(b3[0])

    wmat = jnp.zeros((WMAT_ROWS, LANES), jnp.bfloat16)
    wmat = wmat.at[ROW_W1T:ROW_W1T + N_NODES, 0:N_NODES].set(w1.T.astype(jnp.bfloat16))
    wmat = wmat.at[ROW_W2T:ROW_W2T + N_NODES, 0:N_NODES].set(w2.T.astype(jnp.bfloat16))
    return vec, wmat


def _num_tensorcores():
    """Best-effort TensorCores-per-chip detection (perf-only; 1 is always safe)."""
    try:
        kind = jax.devices()[0].device_kind.lower()
    except Exception:
        return 1
    if "v7" in kind:                      # v7x: 2 TCs per chip
        return 2
    if "v4" in kind or "v5p" in kind:     # megacore generations
        return 2
    return 1                              # v5e / v6e: single TC


def _choose_tiling(batch, num_cores, cap=MAX_TILE):
    """Pick (tile_b, steps, padded_batch).

    Single-TC chips: one tile as large as possible (up to cap) -- no pointless
    grid splitting.  Dual-TC chips: even step count >= 2 so 'parallel' sharding
    balances both cores.  Non-divisible batches are padded up to tile*steps.
    """
    b128 = _round_up(max(batch, 1), LANES)
    cap = max(LANES, _round_up(cap, LANES))
    dual = num_cores >= 2 and b128 > LANES

    steps = _cdiv(b128, cap)
    if dual:
        steps = max(2, steps + (steps % 2))          # smallest even >= cdiv
    tile = min(cap, _round_up(_cdiv(b128, steps), LANES))
    steps = _cdiv(b128, tile)
    if dual and steps % 2:
        steps += 1                                   # keep both TCs busy
    return tile, steps, tile * steps


def mlp_forward_t(xT, params, *, tile_b=None, num_cores=None):
    """Feature-major entry point (preferred: avoids any x.T HBM pass).

    xT: (N_INPUTS, B) float32.  Returns (B, 1) float32.
    params: list of (W, b) with W (in_features, out_features), b (out_features,).
    """
    n_in, B = xT.shape
    assert n_in == N_INPUTS
    if num_cores is None:
        num_cores = _num_tensorcores()
    if tile_b is None:
        tile_b, steps, padded = _choose_tiling(B, num_cores)
    else:
        assert tile_b % LANES == 0
        steps = _cdiv(B, tile_b)
        padded = steps * tile_b

    if padded != B:
        # Arbitrary batch sizes: pad with zeros (safe through every layer),
        # padded outputs are sliced off below.
        xT = jnp.pad(xT, ((0, 0), (0, padded - B)))

    vec, wmat = pack_params(params)

    x_spec = pl.BlockSpec((N_INPUTS, tile_b), lambda i: (0, i))
    vec_spec = pl.BlockSpec((VEC_ROWS, LANES), lambda i: (0, 0))
    wmat_spec = pl.BlockSpec((WMAT_ROWS, LANES), lambda i: (0, 0))
    out_spec = pl.BlockSpec((1, tile_b), lambda i: (0, i))

    out = pl.pallas_call(
        mlp_kernel,
        out_shape=jax.ShapeDtypeStruct((1, padded), jnp.float32),
        grid_spec=pltpu.PrefetchScalarGridSpec(
            num_scalar_prefetch=0,
            grid=(steps,),
            in_specs=[x_spec, vec_spec, wmat_spec],
            out_specs=out_spec,
        ),
        compiler_params=pltpu.CompilerParams(
            dimension_semantics=("parallel",)),
    )(xT, vec, wmat)                                   # (1, padded)

    return out[0, :B].reshape(B, 1)


def mlp_forward(x, params, **kw):
    """Batch-major convenience wrapper matching the PyTorch Model signature:
    x (B, N_INPUTS) -> (B, 1).  Pays one x.T pass; prefer mlp_forward_t."""
    return mlp_forward_t(x.T, params, **kw)


def init_params(key):
    """Deterministic init matching nn.Linear default: U(-1/sqrt(fan_in), 1/sqrt(fan_in))."""
    dims = [(N_INPUTS, N_NODES)]
    for _ in range(1, N_LAYERS):
        dims.append((N_NODES, N_NODES))
    dims.append((N_NODES, 1))

    params = []
    for fan_in, fan_out in dims:
        key, kw_, kb = jax.random.split(key, 3)
        bound = 1.0 / math.sqrt(fan_in)
        w = jax.random.uniform(kw_, (fan_in, fan_out), jnp.float32, -bound, bound)
        b = jax.random.uniform(kb, (fan_out,), jnp.float32, -bound, bound)
        params.append((w, b))
    return params


def reference_forward(x, params):
    """Pure-f32 reference (semantic check)."""
    y = x
    for (w, b) in params[:-1]:
        y = jnp.maximum(y @ w + b, 0.0)
    w, b = params[-1]
    return jax.nn.sigmoid(y @ w + b)


def reference_forward_bf16(x, params):
    """Reference matching the kernel's precision: bf16 MXU operands on the two
    20x20 layers, f32 accumulation everywhere."""
    (w0, b0), (w1, b1), (w2, b2), (w3, b3) = params
    y = jnp.maximum(x @ w0 + b0, 0.0)
    y = jnp.maximum(
        jnp.dot(y.astype(jnp.bfloat16), w1.astype(jnp.bfloat16),
                preferred_element_type=jnp.float32) + b1, 0.0)
    y = jnp.maximum(
        jnp.dot(y.astype(jnp.bfloat16), w2.astype(jnp.bfloat16),
                preferred_element_type=jnp.float32) + b2, 0.0)
    return jax.nn.sigmoid(y @ w3 + b3)


if __name__ == "__main__":
    key = jax.random.PRNGKey(0)
    key, kx, kx2 = jax.random.split(key, 3)
    params = init_params(key)

    # Main run: feature-major input, so the kernel path has no x.T HBM pass.
    B = 256
    xT = jax.random.normal(kx, (N_INPUTS, B), jnp.float32)
    out = jax.block_until_ready(mlp_forward_t(xT, params))
    assert out.shape == (B, 1)

    x = xT.T  # only for the reference check
    ref_match = reference_forward_bf16(x, params)
    ref_f32 = reference_forward(x, params)
    assert jnp.allclose(out, ref_match, atol=1e-3, rtol=1e-3), \
        "mismatch vs matched-precision (bf16-MXU) reference"
    assert jnp.allclose(out, ref_f32, atol=3e-2), \
        "mismatch vs f32 reference (bf16 MXU tolerance)"

    # Second run: arbitrary (non-128-multiple) batch exercises the padding path.
    B2 = 200
    xT2 = jax.random.normal(kx2, (N_INPUTS, B2), jnp.float32)
    out2 = jax.block_until_ready(mlp_forward_t(xT2, params))
    assert out2.shape == (B2, 1)
    assert jnp.allclose(out2, reference_forward_bf16(xT2.T, params), atol=1e-3, rtol=1e-3), \
        "mismatch on padded-batch path"

    print("KERNEL_OK")
</pallas_src>

<mosaic_0001>
module attributes {stable_mosaic.version = 11 : i64} {
  func.func @mlp_kernel(%arg0: i32, %arg1: memref<2x256xf32, #tpu.memory_space<vmem>>, %arg2: memref<24x128xf32, #tpu.memory_space<vmem>>, %arg3: memref<64x128xbf16, #tpu.memory_space<vmem>>, %arg4: memref<1x256xf32, #tpu.memory_space<vmem>>) attributes {dimension_semantics = [#tpu.dimension_semantics<parallel>], iteration_bounds = array<i64: 1>, scalar_prefetch = 0 : i64, scratch_operands = 0 : i64, tpu.core_type = #tpu.core_type<tc>, window_params = [{transform_indices = @transform_0, window_bounds = array<i64: 2, 256>}, {pipeline_mode = #tpu.pipeline_mode<synchronous>, transform_indices = @transform_1, window_bounds = array<i64: 24, 128>}, {pipeline_mode = #tpu.pipeline_mode<synchronous>, transform_indices = @transform_2, window_bounds = array<i64: 64, 128>}, {transform_indices = @transform_3, window_bounds = array<i64: 1, 256>}]} {
    %c0 = arith.constant 0 : index
    %c0_0 = arith.constant 0 : index
    %0 = vector.load %arg1[%c0, %c0_0] : memref<2x256xf32, #tpu.memory_space<vmem>>, vector<2x256xf32>
    %c0_1 = arith.constant 0 : index
    %c0_2 = arith.constant 0 : index
    %1 = vector.load %arg2[%c0_1, %c0_2] : memref<24x128xf32, #tpu.memory_space<vmem>>, vector<20x1xf32>
    %c0_3 = arith.constant 0 : index
    %c1 = arith.constant 1 : index
    %2 = vector.load %arg2[%c0_3, %c1] : memref<24x128xf32, #tpu.memory_space<vmem>>, vector<20x1xf32>
    %c0_4 = arith.constant 0 : index
    %c2 = arith.constant 2 : index
    %3 = vector.load %arg2[%c0_4, %c2] : memref<24x128xf32, #tpu.memory_space<vmem>>, vector<20x1xf32>
    %c0_5 = arith.constant 0 : index
    %c3 = arith.constant 3 : index
    %4 = vector.load %arg2[%c0_5, %c3] : memref<24x128xf32, #tpu.memory_space<vmem>>, vector<20x1xf32>
    %c0_6 = arith.constant 0 : index
    %c4 = arith.constant 4 : index
    %5 = vector.load %arg2[%c0_6, %c4] : memref<24x128xf32, #tpu.memory_space<vmem>>, vector<20x1xf32>
    %c0_7 = arith.constant 0 : index
    %c5 = arith.constant 5 : index
    %6 = vector.load %arg2[%c0_7, %c5] : memref<24x128xf32, #tpu.memory_space<vmem>>, vector<20x1xf32>
    %c0_8 = arith.constant 0 : index
    %c6 = arith.constant 6 : index
    %7 = vector.load %arg2[%c0_8, %c6] : memref<24x128xf32, #tpu.memory_space<vmem>>, vector<1x1xf32>
    %c0_9 = arith.constant 0 : index
    %c0_10 = arith.constant 0 : index
    %8 = vector.load %arg3[%c0_9, %c0_10] : memref<64x128xbf16, #tpu.memory_space<vmem>>, vector<20x20xbf16>
    %c32 = arith.constant 32 : index
    %c0_11 = arith.constant 0 : index
    %9 = vector.load %arg3[%c32, %c0_11] : memref<64x128xbf16, #tpu.memory_space<vmem>>, vector<20x20xbf16>
    %10 = vector.extract_strided_slice %0 {offsets = [0, 0], sizes = [1, 256], strides = [1, 1]} : vector<2x256xf32> to vector<1x256xf32>
    %11 = vector.broadcast %1 : vector<20x1xf32> to vector<20x256xf32>
    %12 = vector.broadcast %10 : vector<1x256xf32> to vector<20x256xf32>
    %13 = arith.mulf %11, %12 : vector<20x256xf32>
    %14 = vector.extract_strided_slice %0 {offsets = [1, 0], sizes = [1, 256], strides = [1, 1]} : vector<2x256xf32> to vector<1x256xf32>
    %15 = vector.broadcast %2 : vector<20x1xf32> to vector<20x256xf32>
    %16 = vector.broadcast %14 : vector<1x256xf32> to vector<20x256xf32>
    %17 = arith.mulf %15, %16 : vector<20x256xf32>
    %18 = arith.addf %13, %17 : vector<20x256xf32>
    %19 = vector.broadcast %4 : vector<20x1xf32> to vector<20x256xf32>
    %20 = arith.addf %18, %19 : vector<20x256xf32>
    %cst = arith.constant 0.000000e+00 : f32
    %21 = vector.broadcast %cst : f32 to vector<20x256xf32>
    %22 = arith.maximumf %20, %21 : vector<20x256xf32>
    %23 = arith.truncf %22 : vector<20x256xf32> to vector<20x256xbf16>
    %cst_12 = arith.constant dense<0.000000e+00> : vector<20x256xf32>
    %24 = tpu.matmul %8, %23, %cst_12 {dimension_numbers = #tpu.dot_dimension_numbers<[1], [0], [0], [1], [0, 0, 1, 1], [], []>} : vector<20x20xbf16>, vector<20x256xbf16>, vector<20x256xf32> -> vector<20x256xf32>
    %25 = vector.broadcast %5 : vector<20x1xf32> to vector<20x256xf32>
    %26 = arith.addf %24, %25 : vector<20x256xf32>
    %cst_13 = arith.constant 0.000000e+00 : f32
    %27 = vector.broadcast %cst_13 : f32 to vector<20x256xf32>
    %28 = arith.maximumf %26, %27 : vector<20x256xf32>
    %29 = arith.truncf %28 : vector<20x256xf32> to vector<20x256xbf16>
    %cst_14 = arith.constant dense<0.000000e+00> : vector<20x256xf32>
    %30 = tpu.matmul %9, %29, %cst_14 {dimension_numbers = #tpu.dot_dimension_numbers<[1], [0], [0], [1], [0, 0, 1, 1], [], []>} : vector<20x20xbf16>, vector<20x256xbf16>, vector<20x256xf32> -> vector<20x256xf32>
    %31 = vector.broadcast %6 : vector<20x1xf32> to vector<20x256xf32>
    %32 = arith.addf %30, %31 : vector<20x256xf32>
    %cst_15 = arith.constant 0.000000e+00 : f32
    %33 = vector.broadcast %cst_15 : f32 to vector<20x256xf32>
    %34 = arith.maximumf %32, %33 : vector<20x256xf32>
    %35 = vector.broadcast %3 : vector<20x1xf32> to vector<20x256xf32>
    %36 = arith.mulf %35, %34 : vector<20x256xf32>
    %cst_16 = arith.constant dense<0.000000e+00> : vector<256xf32>
    %37 = vector.multi_reduction <add>, %36, %cst_16 [0] : vector<20x256xf32> to vector<256xf32>
    %38 = vector.shape_cast %37 : vector<256xf32> to vector<1x256xf32>
    %39 = vector.broadcast %7 : vector<1x1xf32> to vector<1x256xf32>
    %40 = arith.addf %38, %39 : vector<1x256xf32>
    %41 = arith.negf %40 : vector<1x256xf32>
    %42 = math.exp %41 : vector<1x256xf32>
    %cst_17 = arith.constant 1.000000e+00 : f32
    %43 = vector.broadcast %cst_17 : f32 to vector<1x256xf32>
    %44 = arith.addf %43, %42 : vector<1x256xf32>
    %45 = arith.divf %43, %44 : vector<1x256xf32>
    %c0_18 = arith.constant 0 : index
    %c0_19 = arith.constant 0 : index
    %46 = vector.load %arg4[%c0_18, %c0_19] : memref<1x256xf32, #tpu.memory_space<vmem>>, vector<1x256xf32>
    tpu.vector_store %arg4[%c0_18, %c0_19], %45 {strides = array<i32>} : memref<1x256xf32, #tpu.memory_space<vmem>>, vector<1x256xf32>,
    return
  }
  func.func @transform_0(%arg0: i32) -> (i32, i32) {
    %c0_i32 = arith.constant 0 : i32
    %c0_i32_0 = arith.constant 0 : i32
    return %c0_i32, %arg0 : i32, i32
  }
  func.func @transform_1(%arg0: i32) -> (i32, i32) {
    %c0_i32 = arith.constant 0 : i32
    %c0_i32_0 = arith.constant 0 : i32
    %c0_i32_1 = arith.constant 0 : i32
    return %c0_i32, %c0_i32_0 : i32, i32
  }
  func.func @transform_2(%arg0: i32) -> (i32, i32) {
    %c0_i32 = arith.constant 0 : i32
    %c0_i32_0 = arith.constant 0 : i32
    %c0_i32_1 = arith.constant 0 : i32
    return %c0_i32, %c0_i32_0 : i32, i32
  }
  func.func @transform_3(%arg0: i32) -> (i32, i32) {
    %c0_i32 = arith.constant 0 : i32
    %c0_i32_0 = arith.constant 0 : i32
    return %c0_i32, %arg0 : i32, i32
  }
}

</mosaic_0001>

<bundles_post_ra>
// kernel: tpu_custom_call.1
= control target key start
LH: loop header
LB: loop body
LE: loop exit
PB: predicated region body
PF: predicated region fallthrough
CT: control target
= control target key end

     0   :  { %8 = vsyncpa [#allocation3], 0  ;;  %s674_s0 = inlined_call_operand.hbm [shape: f32[2,256], index: 0, kind: input, shape index: {}]   ;;  %s675_s1 = inlined_call_operand.hbm [shape: f32[24,128], index: 1, kind: input, shape index: {}]   ;;  %s676_s2 = inlined_call_operand.hbm [shape: bf16[64,128], index: 2, kind: input, shape index: {}]   ;;  %s677_s3 = inlined_call_operand.hbm [shape: f32[1,256], index: 3, kind: output, shape index: {}]  }
   0x1   :  { %9 = vsyncpa [#allocation6], 0  ;;  %s26_s14 = sshll.u32 %s675_s1, 4  ;;  %s27_s14 = int_to_ptr.hbm [resolvable:$true] %s26_s14 }
   0x2   :  { %10 = vsyncpa [#allocation4], 0  ;;  %s585_s15 = smov [#allocation5]   ;;  %s16_s19 = sshll.u32 %s674_s0, 4  ;;  %s17_s19 = int_to_ptr.hbm [resolvable:$true] %s16_s19 }
   0x3   :  { %s28_s16 = sshll.u32 %s585_s15, 4  ;;  %s586_s20 = smov 128   ;;  %s29_s16 = int_to_ptr.vmem [resolvable:$true] %s28_s16 }
   0x4   :  { %s587_s21 = smov 8   ;;  %s588_s22 = smov [#allocation2]  }
   0x5   :  { %34 = dma.hbm_to_vmem [thread:$0]  %s27_s14, 384, %s29_s16, [#allocation6], %s586_s20, %s586_s20, %s587_s21  }
   0x6   :  { %s18_s23 = sshll.u32 %s588_s22, 4  ;;  %s39_s26 = sshll.u32 %s676_s2, 4  ;;  %s19_s23 = int_to_ptr.vmem [resolvable:$true] %s18_s23  ;;  %s40_s26 = int_to_ptr.hbm [resolvable:$true] %s39_s26 }
   0x7   :  { %21 = dma.hbm_to_vmem [thread:$0]  %s17_s19, 64, %s19_s23, [#allocation3]  }
   0x8   :  { %s589_s1 = smov [#allocation7]   ;;  %s590_s28 = smov 64  }
   0x9   :  { %s41_s27 = sshll.u32 %s589_s1, 4  ;;  %s591_s29 = smov 4   ;;  %s42_s27 = int_to_ptr.vmem [resolvable:$true] %s41_s27 }
   0xa   :  { %47 = dma.hbm_to_vmem [thread:$0]  %s40_s26, 512, %s42_s27, [#allocation6], %s590_s28, %s590_s28, %s591_s29  }
   0xb   :  { %579 = dma.done.wait [#allocation3], 64  }
   0xc   :  { %580 = vsyncadd [#allocation3], 4294967232 }
   0xd   :  { %581 = dma.done.wait [#allocation6], 896  }
   0xe   :  { %582 = vsyncadd [#allocation6], 4294966400  ;;  %v592_v0 = vmov 3   ;;  %v593_v1 = vmov 0   ;;  %v629_v2 = vld [vmem:[#allocation5 + $0x10] sm:$0xf] }
   0xf   :  { %460 = vset.pattern.permute.xlu1 %v592_v0  ;;  %458 = vset.pattern.permute.xlu0 %v593_v1  ;;  %v631_v3 = vld [vmem:[#allocation5 + $0x8] sm:$0xff]  ;;  %v636_v4 = vld [vmem:[#allocation5] sm:$0xff]  ;;  %v594_v5 = vmov 1   ;;  %v61_v7 = vld [vmem:[#allocation2] sm:$0xf]  ;;  %v595_v10 = vmov 4  }
  0x10   :  { %462 = vset.pattern.permute.xlu2 %v593_v1  ;;  %139 = vperm.xlu1 %460, %v629_v2   ;;  %v88_v11 = vperm.slane %v61_v7, 0  ;;  %v89_v12 = vperm.slane %v61_v7, 2  ;;  %v112_v13 = vperm.slane %v61_v7, 1  ;;  %v113_v14 = vperm.slane %v61_v7, 3  ;;  %v441_v61 = vld [vmem:[#allocation7] sm:$0xff]  ;;  %s599_s0 = smov [#allocation8]  }
  0x11   :  { %84 = vperm.xlu0 %458, %v629_v2   ;;  %79 = vperm.xlu2 %462, %v631_v3   ;;  %vm185_vm0 = vcmask 1041408   ;;  %vm178_vm1 = vcmask 162816   ;;  %v68_v62 = vld [vmem:[#allocation7 + $0x8] sm:$0x3]  ;;  %vm331_vm2 = vcmask 1043456   ;;  %s410_s2 = sshll.u32 %s599_s0, 4  ;;  %s411_s2 = int_to_ptr.vmem [resolvable:$true] %s410_s2 }
  0x12   :  { %v92_v15 = vperm.slane %v88_v11, 0  ;;  %v93_v16 = vperm.slane %v89_v12, 0  ;;  %v116_v17 = vperm.slane %v112_v13, 1  ;;  %v117_v18 = vperm.slane %v113_v14, 1  ;;  %s412_s5 = sshll.u32 %s677_s3, 4  ;;  %s413_s5 = int_to_ptr.hbm [resolvable:$true] %s412_s5 }
  0x13   :  { %v175_v63 = vunpack.c.l.b16 %v68_v62  ;;  %v596_v12 = vmov 5   ;;  %vm397_vm10 = vcmask 1040384  }
  0x18   :  { %461 = vset.pattern.permute.xlu1 %v593_v1 }
  0x19   :  { %459 = vset.pattern.permute.xlu0 %v594_v5  ;;  %74 = vperm.xlu1 %461, %v636_v4  }
  0x1a   :  { %109 = vperm.xlu0 %459, %v629_v2   ;;  %463 = vset.pattern.permute.xlu2 %v594_v5 }
  0x1b   :  { %101 = vperm.xlu2 %463, %v636_v4  }
  0x21   :  { %464 = vset.pattern.permute.xlu1 %v594_v5 }
  0x22   :  { %466 = vset.pattern.permute.xlu0 %v592_v0  ;;  %105 = vperm.xlu1 %464, %v631_v3  }
  0x23   :  { %135 = vperm.xlu0 %466, %v631_v3   ;;  %465 = vset.pattern.permute.xlu2 %v592_v0  ;;  %v177_v0 = vpack.c.b16 %v175_v63, %v175_v63 }
  0x24   :  { %131 = vperm.xlu2 %465, %v636_v4  }
  0x2a   :  { %467 = vset.pattern.permute.xlu1 %v595_v10 }
  0x2b   :  { %167 = vperm.xlu1 %467, %v629_v2   ;;  %470 = vset.pattern.permute.xlu0 %v596_v12 }
  0x2c   :  { %468 = vset.pattern.permute.xlu2 %v595_v10  ;;  %243 = vperm.xlu0 %470, %v631_v3  }
  0x2d   :  { %159 = vperm.xlu2 %468, %v636_v4  }
  0x33   :  { %163 = vperm.xlu1 %467, %v631_v3  }
  0x35   :  { %469 = vset.pattern.permute.xlu2 %v596_v12 }
  0x36   :  { %239 = vperm.xlu2 %469, %v636_v4  }
  0x3b   :  { %471 = vset.pattern.permute.xlu1 %v596_v12 }
  0x3c   :  { %247 = vperm.xlu1 %471, %v629_v2  }
  0x6b   :  { %v80_v6 = vpop.permute.xlu2 %79 }
  0x6c   :  { %v96_v42 = vmul.f32 %v92_v15, %v80_v6  ;;  %v97_v43 = vmul.f32 %v93_v16, %v80_v6 }
  0x75   :  { %v102_v19 = vpop.permute.xlu2 %101 }
  0x76   :  { %v118_v26 = vmul.f32 %v116_v17, %v102_v19  ;;  %v119_v30 = vmul.f32 %v117_v18, %v102_v19 }
  0x7e   :  { %v132_v37 = vpop.permute.xlu2 %131 }
  0x82   :  { %v140_v8 = vpop.permute.xlu1 %139 }
  0x83   :  { %v85_v9 = vpop.permute.xlu0 %84 }
  0x84   :  { %v98_v22 = vmul.f32 %v92_v15, %v85_v9  ;;  %v99_v23 = vmul.f32 %v93_v16, %v85_v9 }
  0x87   :  { %v160_v13 = vpop.permute.xlu2 %159 }
  0x8b   :  { %v75_v21 = vpop.permute.xlu1 %74 }
  0x8c   :  { %v110_v20 = vpop.permute.xlu0 %109  ;;  %v94_v29 = vmul.f32 %v92_v15, %v75_v21  ;;  %v95_v31 = vmul.f32 %v93_v16, %v75_v21 }
  0x8d   :  { %v122_v24 = vmul.f32 %v116_v17, %v110_v20  ;;  %v123_v25 = vmul.f32 %v117_v18, %v110_v20 }
  0x8e   :  { %v124_v34 = vadd.f32 %v118_v26, %v94_v29  ;;  %v125_v38 = vadd.f32 %v119_v30, %v95_v31 }
  0x8f   :  { %v128_v27 = vadd.f32 %v122_v24, %v98_v22  ;;  %v129_v28 = vadd.f32 %v123_v25, %v99_v23 }
  0x90   :  { %v142_v46 = vadd.f32 %v132_v37, %v124_v34  ;;  %v143_v50 = vadd.f32 %v132_v37, %v125_v38  ;;  %v598_v34 = vmov 6   ;;  %v442_v37 = vld [vmem:[#allocation7 + $0x10] sm:$0xff]  ;;  %v71_v38 = vld [vmem:[#allocation7 + $0x18] sm:$0x3] }
  0x91   :  { %v146_v32 = vadd.f32 %v140_v8, %v128_v27  ;;  %v147_v33 = vadd.f32 %v140_v8, %v129_v28  ;;  %v65_v28 = vld [vmem:[#allocation5] sm:$0x1]  ;;  %474 = vset.pattern.permute.xlu0 %v598_v34 }
  0x92   :  { %v148_v55 = vmax.f32 %v142_v46, 0.0  ;;  %v149_v56 = vmax.f32 %v143_v50, 0.0  ;;  %351 = vperm.xlu0 %474, %v65_v28  }
  0x93   :  { %v152_v35 = vmax.f32 %v146_v32, 0.0  ;;  %v153_v36 = vmax.f32 %v147_v33, 0.0  ;;  %v597_v33 = vmov 2  }
  0x94   :  { %v106_v39 = vpop.permute.xlu1 %105  ;;  %473 = vset.pattern.permute.xlu1 %v597_v33  ;;  %472 = vset.pattern.permute.xlu2 %v597_v33 }
  0x95   :  { %v156_v40 = vpack.c.bf16 %v152_v35, %v152_v35  ;;  %v157_v41 = vpack.c.bf16 %v153_v36, %v153_v36  ;;  %v120_v44 = vmul.f32 %v116_v17, %v106_v39  ;;  %v121_v45 = vmul.f32 %v117_v18, %v106_v39  ;;  %v136_v49 = vpop.permute.xlu0 %135  ;;  %317 = vperm.xlu1 %473, %v631_v3   ;;  %v240_v3 = vpop.permute.xlu2 %239 }
  0x96   :  { %313 = vperm.xlu2 %472, %v636_v4   ;;  %v255_v39 = vunpack.c.l.b16 %v71_v38 }
  0x97   :  { %v187_v47 = vsel %vm185_vm0, %v156_v40, 0  ;;  %v190_v48 = vsel %vm185_vm0, %v157_v41, 0  ;;  %v126_v51 = vadd.f32 %v120_v44, %v96_v42  ;;  %v127_v52 = vadd.f32 %v121_v45, %v97_v43 }
  0x98   :  { %198 = vmatpush.bf16.msra.mxu0 %v187_v47  ;;  %216 = vmatpush.bf16.msra.mxu1 %v190_v48  ;;  %v257_v40 = vpack.c.b16 %v255_v39, %v255_v39 }
  0x99   :  { %v144_v53 = vadd.f32 %v136_v49, %v126_v51  ;;  %v145_v54 = vadd.f32 %v136_v49, %v127_v52 }
  0x9b   :  { %v150_v57 = vmax.f32 %v144_v53, 0.0  ;;  %v151_v58 = vmax.f32 %v145_v54, 0.0 }
  0x9d   :  { %v154_v59 = vpack.c.bf16 %v150_v57, %v148_v55  ;;  %v155_v60 = vpack.c.bf16 %v151_v58, %v149_v56  ;;  %v168_v6 = vpop.permute.xlu1 %167 }
  0x9e   :  { %321 = vperm.xlu2 %472, %v629_v2   ;;  %v244_v44 = vpop.permute.xlu0 %243 }
  0x9f   :  { %199 = vmatpush.bf16.msra.mxu0 %v154_v59  ;;  %217 = vmatpush.bf16.msra.mxu1 %v155_v60 }
  0xa2   :  { %427 = vmatmul.msk.bf16.vlgmr.msra.gmra.mxu0 %vm178_vm1, %v441_v61  ;;  %429 = vmatmul.msk.bf16.vlgmr.msra.gmra.mxu1 %vm178_vm1, %v441_v61 }
  0xa5   :  { %v164_v9 = vpop.permute.xlu1 %163 }
  0xae   :  { %v248_v43 = vpop.permute.xlu1 %247 }
  0xb2   :  { %428 = vmatmul.msk.bf16.gmra.mxu0 %vm178_vm1, %v177_v0  ;;  %430 = vmatmul.msk.bf16.gmra.mxu1 %vm178_vm1, %v177_v0 }
  0xf0   :  { %v314_v46 = vpop.permute.xlu2 %313 }
 0x107   :  { %v318_v52 = vpop.permute.xlu1 %317 }
 0x11f   :  { %v201_v1 = vpop.f32.mrf.mxu0  ;;  %v219_v5 = vpop.f32.mrf.mxu1 }
 0x120   :  { %v202_v20 = vadd.f32 %v201_v1, %v160_v13  ;;  %v220_v21 = vadd.f32 %v219_v5, %v160_v13  ;;  %v322_v1 = vpop.permute.xlu2 %321 }
 0x122   :  { %v228_v29 = vmax.f32 %v202_v20, 0.0  ;;  %v229_v30 = vmax.f32 %v220_v21, 0.0 }
 0x127   :  { %v203_v7 = vpop.f32.mrf.mxu0  ;;  %v221_v8 = vpop.f32.mrf.mxu1 }
 0x128   :  { %v204_v16 = vadd.f32 %v203_v7, %v164_v9  ;;  %v222_v17 = vadd.f32 %v221_v8, %v164_v9 }
 0x12a   :  { %v230_v24 = vmax.f32 %v204_v16, 0.0  ;;  %v231_v25 = vmax.f32 %v222_v17, 0.0 }
 0x12c   :  { %v234_v35 = vpack.c.bf16 %v230_v24, %v228_v29  ;;  %v235_v36 = vpack.c.bf16 %v231_v25, %v229_v30  ;;  %v352_v25 = vpop.permute.xlu0 %351 }
 0x12f   :  { %v206_v10 = vpop.f32.mrf.mxu0  ;;  %v224_v11 = vpop.f32.mrf.mxu1 }
 0x130   :  { %v207_v14 = vadd.f32 %v206_v10, %v168_v6  ;;  %v225_v15 = vadd.f32 %v224_v11, %v168_v6 }
 0x132   :  { %v232_v18 = vmax.f32 %v207_v14, 0.0  ;;  %v233_v19 = vmax.f32 %v225_v15, 0.0 }
 0x134   :  { %v236_v22 = vpack.c.bf16 %v232_v18, %v232_v18  ;;  %v237_v23 = vpack.c.bf16 %v233_v19, %v233_v19 }
 0x136   :  { %v265_v26 = vsel %vm185_vm0, %v236_v22, 0  ;;  %v268_v27 = vsel %vm185_vm0, %v237_v23, 0 }
 0x137   :  { %v208_v31 = vpop.f32.mrf.mxu0  ;;  %v226_v32 = vpop.f32.mrf.mxu1  ;;  %276 = vmatpush.bf16.msra.mxu2 %v265_v26  ;;  %294 = vmatpush.bf16.msra.mxu3 %v268_v27 }
 0x13b   :  { %277 = vmatpush.bf16.msra.mxu2 %v234_v35  ;;  %295 = vmatpush.bf16.msra.mxu3 %v235_v36 }
 0x13e   :  { %435 = vmatmul.msk.bf16.vlgmr.msra.gmra.mxu2 %vm178_vm1, %v442_v37  ;;  %437 = vmatmul.msk.bf16.vlgmr.msra.gmra.mxu3 %vm178_vm1, %v442_v37 }
 0x14e   :  { %436 = vmatmul.msk.bf16.gmra.mxu2 %vm178_vm1, %v257_v40  ;;  %438 = vmatmul.msk.bf16.gmra.mxu3 %vm178_vm1, %v257_v40 }
 0x1c1   :  { %v279_v41 = vpop.f32.mrf.mxu2  ;;  %v297_v42 = vpop.f32.mrf.mxu3 }
 0x1c2   :  { %v280_v49 = vadd.f32 %v279_v41, %v240_v3  ;;  %v298_v50 = vadd.f32 %v297_v42, %v240_v3 }
 0x1c4   :  { %v306_v53 = vmax.f32 %v280_v49, 0.0  ;;  %v307_v54 = vmax.f32 %v298_v50, 0.0  ;;  %v400_v49 = vlaneseq }
 0x1c6   :  { %v324_v63 = vmul.f32 %v314_v46, %v306_v53  ;;  %v325_v0 = vmul.f32 %v314_v46, %v307_v54  ;;  %vm402_vm12 = vcmp.lt.s32.totalorder %v400_v49, 256 }
 0x1c9   :  { %v281_v45 = vpop.f32.mrf.mxu2  ;;  %v299_v4 = vpop.f32.mrf.mxu3 }
 0x1ca   :  { %v282_v47 = vadd.f32 %v281_v45, %v244_v44  ;;  %v300_v48 = vadd.f32 %v299_v4, %v244_v44 }
 0x1cc   :  { %v308_v51 = vmax.f32 %v282_v47, 0.0  ;;  %v309_v2 = vmax.f32 %v300_v48, 0.0 }
 0x1ce   :  { %v326_v59 = vmul.f32 %v318_v52, %v308_v51  ;;  %v327_v60 = vmul.f32 %v318_v52, %v309_v2 }
 0x1d0   :  { %v330_v7 = vadd.f32 %v326_v59, %v324_v63  ;;  %v340_v8 = vadd.f32 %v327_v60, %v325_v0 }
 0x1d1   :  { %v284_v55 = vpop.f32.mrf.mxu2  ;;  %v302_v56 = vpop.f32.mrf.mxu3 }
 0x1d2   :  { %v285_v57 = vadd.f32 %v284_v55, %v248_v43  ;;  %v303_v58 = vadd.f32 %v302_v56, %v248_v43 }
 0x1d4   :  { %v310_v61 = vmax.f32 %v285_v57, 0.0  ;;  %v311_v62 = vmax.f32 %v303_v58, 0.0 }
 0x1d6   :  { %v328_v5 = vmul.f32 %v322_v1, %v310_v61  ;;  %v329_v6 = vmul.f32 %v322_v1, %v311_v62 }
 0x1d8   :  { %v332_v9 = vsel %vm331_vm2, %v328_v5, 0.0  ;;  %v341_v10 = vsel %vm331_vm2, %v329_v6, 0.0 }
 0x1d9   :  { %v333_v11 = vadd.f32 %v332_v9, %v330_v7  ;;  %v342_v12 = vadd.f32 %v341_v10, %v340_v8  ;;  %v286_v13 = vpop.f32.mrf.mxu2  ;;  %v304_v14 = vpop.f32.mrf.mxu3 }
 0x1db   :  { %v334_v15 = vrot.slane %v333_v11, 4  ;;  %v343_v16 = vrot.slane %v342_v12, 4 }
 0x1dd   :  { %v335_v17 = vadd.f32 %v334_v15, %v333_v11  ;;  %v344_v18 = vadd.f32 %v343_v16, %v342_v12 }
 0x1df   :  { %v336_v19 = vrot.slane %v335_v17, 2  ;;  %v345_v20 = vrot.slane %v344_v18, 2 }
 0x1e1   :  { %v337_v21 = vadd.f32 %v336_v19, %v335_v17  ;;  %v346_v22 = vadd.f32 %v345_v20, %v344_v18 }
 0x1e3   :  { %v338_v23 = vrot.slane %v337_v21, 1  ;;  %v347_v24 = vrot.slane %v346_v22, 1 }
 0x1e5   :  { %v339_v26 = vadd.f32 %v338_v23, %v337_v21  ;;  %v348_v27 = vadd.f32 %v347_v24, %v346_v22 }
 0x1e7   :  { %v354_v28 = vadd.f32 %v352_v25, %v339_v26  ;;  %v355_v29 = vadd.f32 %v352_v25, %v348_v27 }
 0x1e9   :  { %v439_v30 = vmul.f32 -1.442695, %v354_v28  ;;  %v440_v31 = vmul.f32 -1.442695, %v355_v29 }
 0x1eb   :  { %475 = vpow2.f32 %v439_v30 }
 0x1ec   :  { %477 = vpow2.f32 %v440_v31 }
 0x1f1   :  { %v476_v32 = vpop.eup %475 }
 0x1f2   :  { %v478_v33 = vpop.eup %477  ;;  %v362_v34 = vadd.f32 1.0, %v476_v32 }
 0x1f3   :  { %v363_v35 = vadd.f32 1.0, %v478_v33 }
 0x1f4   :  { %479 = vrcp.f32 %v362_v34  ;;  %vm369_vm5 = vweird.f32 %v362_v34  ;;  %v375_v4 = vand.u32 2147483648, %v362_v34  ;;  %v373_v47 = vand.u32 2147483647, %v362_v34 }
 0x1f5   :  { %481 = vrcp.f32 %v363_v35  ;;  %v390_v42 = vand.u32 2147483648, %v363_v35  ;;  %v388_v44 = vand.u32 2147483647, %v363_v35  ;;  %vm384_vm6 = vweird.f32 %v363_v35 }
 0x1f6   :  { %v376_v52 = vor.u32 1.1754944e-38, %v375_v4  ;;  %vm374_vm11 = vcmp.eq.f32.partialorder %v373_v47, 8.507059e+37 }
 0x1f7   :  { %v391_v50 = vor.u32 1.1754944e-38, %v390_v42  ;;  %vm389_vm9 = vcmp.eq.f32.partialorder %v388_v44, 8.507059e+37 }
 0x1fa   :  { %v480_v36 = vpop.eup %479 }
 0x1fb   :  { %v482_v37 = vpop.eup %481  ;;  %v365_v38 = vmul.f32 %v480_v36, %v362_v34  ;;  %vm370_vm3 = vweird.f32 %v480_v36 }
 0x1fc   :  { %v380_v39 = vmul.f32 %v482_v37, %v363_v35  ;;  %vm385_vm4 = vweird.f32 %v482_v37  ;;  %vm665_vm7 = vmor %vm369_vm5, %vm370_vm3 }
 0x1fd   :  { %v366_v40 = vsub.f32 1.0, %v365_v38  ;;  %vm386_vm8 = vmor %vm384_vm6, %vm385_vm4 }
 0x1fe   :  { %v381_v3 = vsub.f32 1.0, %v380_v39 }
 0x1ff   :  { %v367_v41 = vmul.f32 %v480_v36, %v366_v40 }
 0x200   :  { %v382_v43 = vmul.f32 %v482_v37, %v381_v3 }
 0x201   :  { %v368_v45 = vadd.f32 %v480_v36, %v367_v41 }
 0x202   :  { %v383_v48 = vadd.f32 %v482_v37, %v382_v43 }
 0x203   :  { %v372_v51 = vsel %vm665_vm7, %v480_v36, %v368_v45 }
 0x204   :  { %v387_v2 = vsel %vm386_vm8, %v482_v37, %v383_v48  ;;  %v377_v55 = vsel %vm374_vm11, %v376_v52, %v372_v51 }
 0x205   :  { %v392_v53 = vsel %vm389_vm9, %v391_v50, %v387_v2 }
 0x206   :  { %v396_v54 = vrot.slane %v392_v53, 7 }
 0x208   :  { %v398_v56 = vsel %vm397_vm10, %v377_v55, %v396_v54 }
 0x209   :  { %404 = vst.msk [vmem:[#allocation8] sm:$0x3] %vm402_vm12, %v398_v56 }
 0x20a   :  { %415 = dma.vmem_to_hbm [thread:$0]  %s411_s2, 32, %s413_s5, [#allocation4]  }
 0x20b   :  { %583 = dma.done.wait [#allocation4], 32  }
 0x20c   :  { %584 = vsyncadd [#allocation4], 4294967264 }
 0x20d   :  { %420 = vsyncpa [#allocation3], 1 }
 0x20e   :  { %421 = vsyncpa [#allocation6], 1 }
 0x20f   :  { %422 = vsyncpa [#allocation4], 1 }

</bundles_post_ra>
